<compile_context>
chip_gen: v5e
topology: v5e:2x2
jax: 0.10.0
libtpu: 0.0.40
codegen_flags: <defaults>
</compile_context>

<pallas_src>
import jax
import jax.numpy as jnp
from jax.experimental import pallas as pl
from jax.experimental.pallas import tpu as pltpu

_LANES = 128


def _linear_kernel(w_ref, b_ref, x_ref, o_ref):
    # Hot path: y = x * w + b. Linear(1, 1) degenerates to a scalar
    # multiply-add; w/b are read once from SMEM and broadcast by the compiler.
    o_ref[...] = x_ref[...] * w_ref[0] + b_ref[0]


def _round_up(x, m):
    return (x + m - 1) // m * m


def linear_regression_forward(x, weight, bias, *, tm=4096, min_pallas_n=65536):
    """nn.Linear(1, 1) forward: y = x @ W^T + b.

    x: (N, 1) f32, weight: (1, 1) f32, bias: (1,) f32 -> (N, 1) f32.
    For best performance wrap the call in jax.jit so the lane-dense reshapes
    fuse away; tm=8192 is a good choice on v7x.
    """
    n, f = x.shape
    assert f == 1 and weight.shape == (1, 1) and bias.shape == (1,)

    w_flat = weight.reshape(1)
    b_flat = bias.reshape(1)

    # Tiny batches: per-pallas_call overhead + wrapper reshapes dominate; a
    # single fused XLA fma is strictly faster on every TPU generation.
    if n < min_pallas_n:
        return x * w_flat[0] + b_flat[0]

    tm = max(8, _round_up(tm, 8))  # row tiles must satisfy the (8,128) rule

    # Lane-dense view: (N,) -> (rows, 128); pad at most 127 elements (ragged
    # N only). Aligned batches are fully zero-copy (reshape only).
    rows = pl.cdiv(n, _LANES)
    n_pad = rows * _LANES

    x_flat = x.reshape(n)
    if n_pad != n:
        x_flat = jnp.pad(x_flat, (0, n_pad - n))  # padded rows discarded below
    x2d = x_flat.reshape(rows, _LANES)

    # Fixed tile for large batches; single full-array block when it fits
    # (block == full array dims also satisfies the divisibility rule for row
    # counts that are not multiples of 8). Partial trailing blocks are handled
    # by Pallas (masked output stores).
    tm_eff = tm if rows > tm else rows
    grid = (pl.cdiv(rows, tm_eff),)

    out2d = pl.pallas_call(
        _linear_kernel,
        out_shape=jax.ShapeDtypeStruct((rows, _LANES), x.dtype),
        grid=grid,
        in_specs=[
            # Scalar params live in SMEM: no (8,128)-padded VMEM tiles and no
            # per-iteration double-buffered DMAs for two lone scalars.
            pl.BlockSpec(memory_space=pltpu.MemorySpace.SMEM),
            pl.BlockSpec(memory_space=pltpu.MemorySpace.SMEM),
            pl.BlockSpec((tm_eff, _LANES), lambda i: (i, 0)),
        ],
        out_specs=pl.BlockSpec((tm_eff, _LANES), lambda i: (i, 0)),
        compiler_params=pltpu.CompilerParams(
            # Independent batch tiles -> megacore sharding on v7x (harmless on
            # single-TC v5e/v6e).
            dimension_semantics=("parallel",),
        ),
    )(w_flat, b_flat, x2d)

    if n_pad == n:
        return out2d.reshape(n, 1)          # aligned: zero-copy epilogue
    return out2d.reshape(n_pad)[:n].reshape(n, 1)


if __name__ == "__main__":
    key = jax.random.PRNGKey(0)
    kx1, kx2, kx3, kw, kb = jax.random.split(key, 5)

    # Deterministic parameter init mirroring nn.Linear(1, 1) default
    # (uniform in [-1/sqrt(in_features), 1/sqrt(in_features)] = [-1, 1]).
    weight = jax.random.uniform(kw, (1, 1), jnp.float32, minval=-1.0, maxval=1.0)
    bias = jax.random.uniform(kb, (1,), jnp.float32, minval=-1.0, maxval=1.0)

    def ref(xv):
        return xv @ weight.T + bias

    # 1) Tiny batch (N=8): dispatches to the plain fused-XLA fast path.
    x_small = jax.random.normal(kx1, (8, 1), jnp.float32)
    y_small = jax.block_until_ready(linear_regression_forward(x_small, weight, bias))
    assert y_small.shape == (8, 1)
    assert jnp.allclose(y_small, ref(x_small), atol=1e-6), "small-batch mismatch"

    # 2) Ragged batch (N=2085 -> rows=17) with tm=8 forced through Pallas:
    #    3-step grid with a partial trailing block, verifying that OOB rows of
    #    the last block are masked / discarded correctly.
    n = 2085
    x_mid = jax.random.normal(kx2, (n, 1), jnp.float32)
    y_mid = jax.block_until_ready(
        linear_regression_forward(x_mid, weight, bias, tm=8, min_pallas_n=0)
    )
    assert y_mid.shape == (n, 1)
    assert jnp.allclose(y_mid, ref(x_mid), atol=1e-6), "mid-batch mismatch"

    # 3) Aligned batch (N=4096): zero-copy lane-dense path, single full-array
    #    block with the default tile cap.
    n2 = 4096
    x_big = jax.random.normal(kx3, (n2, 1), jnp.float32)
    y_big = jax.block_until_ready(
        linear_regression_forward(x_big, weight, bias, min_pallas_n=0)
    )
    assert y_big.shape == (n2, 1)
    assert jnp.allclose(y_big, ref(x_big), atol=1e-6), "big-batch mismatch"

    print("KERNEL_OK")
</pallas_src>

<mosaic_0001>
module attributes {stable_mosaic.version = 11 : i64} {
  func.func @_linear_kernel(%arg0: i32, %arg1: memref<1xf32, #tpu.memory_space<smem>>, %arg2: memref<1xf32, #tpu.memory_space<smem>>, %arg3: memref<8x128xf32, #tpu.memory_space<vmem>>, %arg4: memref<8x128xf32, #tpu.memory_space<vmem>>) attributes {dimension_semantics = [#tpu.dimension_semantics<parallel>], iteration_bounds = array<i64: 3>, scalar_prefetch = 0 : i64, scratch_operands = 0 : i64, tpu.core_type = #tpu.core_type<tc>, window_params = [{transform_indices = @transform_0, window_bounds = array<i64: 1>}, {transform_indices = @transform_1, window_bounds = array<i64: 1>}, {transform_indices = @transform_2, window_bounds = array<i64: 8, 128>}, {transform_indices = @transform_3, window_bounds = array<i64: 8, 128>}]} {
    %c0 = arith.constant 0 : index
    %c0_0 = arith.constant 0 : index
    %0 = vector.load %arg3[%c0, %c0_0] : memref<8x128xf32, #tpu.memory_space<vmem>>, vector<8x128xf32>
    %c0_1 = arith.constant 0 : index
    %1 = memref.load %arg1[%c0_1] : memref<1xf32, #tpu.memory_space<smem>>
    %2 = vector.broadcast %1 : f32 to vector<8x128xf32>
    %3 = arith.mulf %0, %2 : vector<8x128xf32>
    %c0_2 = arith.constant 0 : index
    %4 = memref.load %arg2[%c0_2] : memref<1xf32, #tpu.memory_space<smem>>
    %5 = vector.broadcast %4 : f32 to vector<8x128xf32>
    %6 = arith.addf %3, %5 : vector<8x128xf32>
    %c0_3 = arith.constant 0 : index
    %c0_4 = arith.constant 0 : index
    %7 = vector.load %arg4[%c0_3, %c0_4] : memref<8x128xf32, #tpu.memory_space<vmem>>, vector<8x128xf32>
    tpu.vector_store %arg4[%c0_3, %c0_4], %6 {strides = array<i32>} : memref<8x128xf32, #tpu.memory_space<vmem>>, vector<8x128xf32>,
    return
  }
  func.func @transform_0(%arg0: i32) -> i32 {
    %c0_i32 = arith.constant 0 : i32
    %c0_i32_0 = arith.constant 0 : i32
    return %c0_i32 : i32
  }
  func.func @transform_1(%arg0: i32) -> i32 {
    %c0_i32 = arith.constant 0 : i32
    %c0_i32_0 = arith.constant 0 : i32
    return %c0_i32 : i32
  }
  func.func @transform_2(%arg0: i32) -> (i32, i32) {
    %c0_i32 = arith.constant 0 : i32
    %c0_i32_0 = arith.constant 0 : i32
    return %arg0, %c0_i32 : i32, i32
  }
  func.func @transform_3(%arg0: i32) -> (i32, i32) {
    %c0_i32 = arith.constant 0 : i32
    %c0_i32_0 = arith.constant 0 : i32
    return %arg0, %c0_i32 : i32, i32
  }
}

</mosaic_0001>

<bundles_post_ra>
// kernel: tpu_custom_call.1
= control target key start
LH: loop header
LB: loop body
LE: loop exit
PB: predicated region body
PF: predicated region fallthrough
CT: control target
= control target key end

     0   :  { %s591_s0 = inlined_call_operand.<no memory space> [shape: f32[1], index: 0, kind: input, shape index: {}]   ;;  %s592_s1 = inlined_call_operand.<no memory space> [shape: f32[1], index: 1, kind: input, shape index: {}]   ;;  %s593_s2 = inlined_call_operand.hbm [shape: f32[17,128], index: 2, kind: input, shape index: {}]   ;;  %s594_s3 = inlined_call_operand.hbm [shape: f32[17,128], index: 3, kind: output, shape index: {}]  }
   0x1   :  { %8 = sst [smem:[#allocation2]] %s591_s0 }
   0x2   :  { %9 = sst [smem:[#allocation3]] %s592_s1 }
   0x3   :  { %10 = vsyncpa [#allocation5], 0 }
   0x4   :  { %12 = vsyncpa [#allocation5 + $0x1], 0 }
   0x5   :  { %13 = vsyncpa [#allocation6], 0 }
   0x6   :  { %15 = vsyncpa [#allocation6 + $0x1], 0  ;;  %s466_s16 = smov 0   ;;  %s468_s17 = smov 0  }
   0x7   :  { %s470_s18 = smov 0   ;;  %s472_s19 = smov 0  }
   0x8 LB: > { %s487_s0 = sadd.s32 4294967295, %s438_s19   ;;  %s284_s1 = sadd.s32 4294967294, %s438_s19   ;;  %s438_s19 = sphi %s472_s19, %s603_s19   ;;  %s434_s18 = sphi %s470_s18, %s602_s18   ;;  %s430_s17 = sphi %s468_s17, %s601_s17   ;;  %s426_s16 = sphi %s466_s16, %s600_s16  }
   0x9   : > { %s491_s20 = sadd.s32 1, %s438_s19   ;;  %s70_s21 = sadd.s32 1, %s434_s18 }
   0xa   : > { %s67_s22 = ssub.s32 %s438_s19, %s491_s20  ;;  %p77_p0 = scmp.ne.s32.totalorder %s434_s18, %s430_s17 }
   0xb   : > { %p68_p1 = scmp.eq.s32.totalorder %s67_s22, 0  ;;  %p78_p2 = scmp.eq.s32.totalorder %s438_s19, 0 }
   0xc   : > { %p83_p3 = scmp.ne.s32.totalorder %s430_s17, %s426_s16  ;;  %p84_p4 = scmp.eq.s32.totalorder %s487_s0, 0 }
   0xd   : > { %s503_s23 = scalar_select %p68_p1, %s434_s18, %s70_s21  }
   0xe   : > { %p505_p5 = por %p78_p2, %p77_p0  ;;  %p509_p6 = por %p84_p4, %p83_p3 }
   0xf   : > { %p107_p7 = scmp.eq.s32.totalorder %s487_s0, 2  ;;  %p113_p8 = scmp.eq.s32.totalorder %s284_s1, 2 }
  0x10   : > { %p308_p9 = scmp.lt.s32.totalorder %s438_s19, 3  ;;  %s139_s28 = sand.u32 1, %s434_s18  }
  0x11   : > { %p515_p10 = por %p107_p7, %p77_p0  ;;  %p519_p11 = por %p113_p8, %p83_p3 }
  0x12   : > { %s288_s29 = sshll.u32 %s438_s19, 3  ;;  %s287_s30 = sshll.u32 %s139_s28, 3 }
  0x13   : > { %s147_s6 = scalar_lea.hbm %s593_s2, %s288_s29  ;;  %s143_s8 = scalar_lea.vmem [#allocation4], %s287_s30 }
  0x14   : > { %s149_s7 = sshll.u32 %s147_s6, 4  ;;  %s151_s9 = sshll.u32 %s143_s8, 4  ;;  %s150_s7 = int_to_ptr.hbm [resolvable:$true] %s149_s7  ;;  %s152_s9 = int_to_ptr.vmem [resolvable:$true] %s151_s9 }
  0x15   : > { %p530_p12 = pnand %p308_p9, %p505_p5  ;;  %p289_p13 = scmp.ge.s32.totalorder %s438_s19, 1 }
  0x16   : > { %p156_p0 = scmp.lt.s32.totalorder %s438_s19, 4  ;;  %s140_s11 = scalar_lea.sflag [#allocation5], %s139_s28 }
  0x17   : > { %s342_s12 = sshra.s32 %s150_s7, 4  ;;  %p346_p2 = pneg %p530_p12  ;;  %s343_s12 = int_to_ptr.hbm [resolvable:$true] %s342_s12 }
  0x18   : > { %s344_s13 = scalar_lea.hbm %s343_s12, 8  ;;  %s349_s1 = scalar_lea.hbm %s593_s2, 24 }
  0x19   : > { %p345_p1 = scmp.ne.s32.totalorder %s343_s12, %s344_s13  ;;  %p350_p5 = scmp.lt.s32.totalorder %s343_s12, %s593_s2 }
  0x1a   : > { %p351_p7 = scmp.lt.s32.totalorder %s349_s1, %s344_s13 }
  0x1b   : > { %p347_p3 = pnand %p346_p2, %p345_p1 }
  0x1c   : > { %p352_p8 = por %p351_p7, %p350_p5 }
  0x1d   : > { %p348_p4 = pneg %p347_p3 }
  0x1f   : > { %p353_p9 = pnand %p352_p8, %p348_p4 }
  0x21   : > { %356 = shalt.err (!%p353_p9)
}
  0x22   : > { %303 = dma.hbm_to_vmem [thread:$0]  (!%p530_p12), %s150_s7, 128, %s152_s9, %s140_s11  }
  0x23   : > { %p157_p1 = pnand %p289_p13, %p156_p0 }
  0x24   : > { %s551_s24 = sand.u32 (!%p157_p1), 1, %s430_s17  }
  0x25   : > { %160 = sbr.rel (%p157_p1) target bundleno = 59 (0x3b), region = 32  ;;  %s290_s28 = sshll.u32 (!%p157_p1), %s551_s24, 3 }
  0x26   : > { %s163_s29 = scalar_lea.sflag (!%p157_p1), [#allocation5], %s551_s24  ;;  %s166_s30 = scalar_lea.vmem (!%p157_p1), [#allocation4], %s290_s28 }
  0x2a   : > { %417 = dma.done.wait (%p509_p6), %s163_s29, 128  }
  0x2b   : > { %419 = vsyncadd (%p509_p6), %s163_s29, 4294967168  ;;  %s191_s4 = sld [smem:[#allocation2]]  ;;  %s293_s6 = sshll.u32 %s487_s0, 3  ;;  %v190_v0 = vld [vmem:[%s166_s30] sm:$0xff] }
  0x2c   : > { %s194_s5 = sld [smem:[#allocation3]]  ;;  %s209_s9 = scalar_lea.hbm %s594_s3, %s293_s6 }
  0x2d   : > { %s189_s10 = scalar_lea.vmem [#allocation7], %s290_s28  ;;  %s213_s12 = sshll.u32 %s209_s9, 4  ;;  %s214_s12 = int_to_ptr.hbm [resolvable:$true] %s213_s12 }
  0x2e   : > { %s211_s11 = sshll.u32 %s189_s10, 4  ;;  %s199_s25 = scalar_lea.sflag [#allocation6], %s551_s24  ;;  %s212_s11 = int_to_ptr.vmem [resolvable:$true] %s211_s11 }
  0x2f   : > { %s386_s13 = sshra.s32 %s214_s12, 4  ;;  %s392_s1 = scalar_lea.hbm %s594_s3, 24  ;;  %s387_s13 = int_to_ptr.hbm [resolvable:$true] %s386_s13 }
  0x30   : > { %s388_s0 = scalar_lea.hbm %s387_s13, 8  ;;  %p393_p0 = scmp.lt.s32.totalorder %s387_s13, %s594_s3 }
  0x31   : > { %v192_v1 = vstv %s191_s4  ;;  %p389_p6 = scmp.ne.s32.totalorder %s387_s13, %s388_s0  ;;  %p394_p2 = scmp.lt.s32.totalorder %s392_s1, %s388_s0 }
  0x32   : > { %v193_v2 = vmul.f32 %v192_v1, %v190_v0  ;;  %v195_v3 = vstv %s194_s5 }
  0x33   : > { %p390_p12 = pnand %p389_p6, %p515_p10  ;;  %p395_p3 = por %p394_p2, %p393_p0 }
  0x34   : > { %v196_v4 = vadd.f32 %v195_v3, %v193_v2 }
  0x35   : > { %p391_p13 = pneg %p390_p12 }
  0x36   : > { %197 = vst [vmem:[%s189_s10] sm:$0xff] %v196_v4 }
  0x37   : > { %p396_p4 = pnand %p395_p3, %p391_p13 }
  0x39   : > { %399 = shalt.err (!%p396_p4)
}
  0x3a   : > { %298 = dma.vmem_to_hbm [thread:$0]  (%p515_p10), %s212_s11, 128, %s214_s12, %s199_s25  }
  0x3b PF: > { %p309_p5 = scmp.ge.s32.totalorder %s438_s19, 2  ;;  %s225_s24 = sand.u32 1, %s426_s16  }
  0x3c   : > { %s226_s28 = scalar_lea.sflag [#allocation6], %s225_s24 }
  0x3d   : > { %p305_p7 = pnand %p309_p5, %p519_p11 }
  0x3f   : > { %p306_p8 = pneg %p305_p7 }
  0x41   : > { %421 = dma.done.wait (%p306_p8), %s226_s28, 128  }
  0x42   : > { %423 = vsyncadd (%p306_p8), %s226_s28, 4294967168  ;;  %p18_p9 = scmp.ge.s32.totalorder %s491_s20, 5   ;;  %s600_s16 = smov %s430_s17 }
  0x43   : > { %s601_s17 = smov %s434_s18  ;;  %s602_s18 = smov %s503_s23 }
  0x44   : > { %s603_s19 = smov %s491_s20  ;;  %20 = sbr.rel (!%p18_p9) target bundleno = 8 (0x8), region = 77 }
  0x49   :  { %232 = vsyncpa [#allocation5], 1 }
  0x4a   :  { %234 = vsyncpa [#allocation5 + $0x1], 1 }
  0x4b   :  { %235 = vsyncpa [#allocation6], 1 }
  0x4c   :  { %237 = vsyncpa [#allocation6 + $0x1], 1 }

</bundles_post_ra>
